<compile_context>
chip_gen: v7x
topology: tpu7x:2x2x1
jax: 0.10.0
libtpu: 0.0.40
codegen_flags: <defaults>
</compile_context>

<pallas_src>
import functools

import jax
import jax.numpy as jnp
from jax.experimental import pallas as pl
from jax.experimental.pallas import tpu as pltpu

HIDDEN = 20  # matches nn.Linear(input_dim, 20)


def _round_up(x, m):
    return ((x + m - 1) // m) * m


def _cdiv(a, b):
    return -(-a // b)


# ----------------------------------------------------------------------------
# Pallas kernel: fused  relu( relu(Xp @ W1_bd + b1) @ W2_bd + b2 )
# ----------------------------------------------------------------------------
def _deepset_mlp_kernel(x_ref, w1_ref, b1_ref, w2_ref, b2_ref, o_ref):
    # x_ref : (TILE_P, PACK*input_dim)   lane-dense packed rows
    # w1_ref: (PACK*input_dim, PHID)     block-diagonal, zero-padded columns
    # b1_ref: (1, PHID)
    # w2_ref: (PHID, PACK*output_dim)    block-diagonal, zero-padded rows
    # b2_ref: (1, PACK*output_dim)
    # o_ref : (TILE_P, PACK*output_dim)
    h = jnp.dot(x_ref[...], w1_ref[...], preferred_element_type=jnp.float32)
    h = jnp.maximum(h + b1_ref[...], 0.0)                       # ReLU(fc1)
    y = jnp.dot(h, w2_ref[...], preferred_element_type=jnp.float32)
    o_ref[...] = jnp.maximum(y + b2_ref[...], 0.0).astype(o_ref.dtype)  # ReLU(fc2)


# ----------------------------------------------------------------------------
# One-time parameter preparation (hoisted out of the per-forward hot path)
# ----------------------------------------------------------------------------
def choose_pack(input_dim, max_lanes=128):
    # Pack as many logical rows as fit in the lane width.  On v5e, pass
    # max_lanes=64 (pack=8 for input_dim=8) to halve the MXU FLOP inflation
    # if the kernel flips MXU-bound at f32.
    if input_dim >= max_lanes:
        return 1
    return max(1, max_lanes // input_dim)


def pack_params(params, *, input_dim, output_dim, pack):
    """Block-diagonal expanded weights + replicated biases (exact per-row)."""
    hidden = params["w1"].shape[1]
    eye = jnp.eye(pack, dtype=jnp.float32)
    w1e = jnp.kron(eye, params["w1"].astype(jnp.float32))   # (pack*in, pack*hid)
    w2e = jnp.kron(eye, params["w2"].astype(jnp.float32))   # (pack*hid, pack*out)
    b1e = jnp.tile(params["b1"].reshape(1, hidden).astype(jnp.float32), (1, pack))
    b2e = jnp.tile(params["b2"].reshape(1, output_dim).astype(jnp.float32), (1, pack))

    # Pad the packed hidden width up to a multiple of 128 lanes.  Exact:
    # the extra hidden units are 0 (+ zero bias) after ReLU and multiply zero
    # rows of w2e, contributing nothing.
    phid_raw = pack * hidden
    phid = _round_up(phid_raw, 128)
    if phid != phid_raw:
        w1e = jnp.pad(w1e, ((0, 0), (0, phid - phid_raw)))
        b1e = jnp.pad(b1e, ((0, 0), (0, phid - phid_raw)))
        w2e = jnp.pad(w2e, ((0, phid - phid_raw), (0, 0)))
    return {"w1e": w1e, "b1e": b1e, "w2e": w2e, "b2e": b2e}


# ----------------------------------------------------------------------------
# pallas_call wrapper on packed rows
# ----------------------------------------------------------------------------
def _mlp_pallas_packed(xp, w1e, b1e, w2e, b2e, *, tile_p):
    n_packed, pin = xp.shape
    phid = w1e.shape[1]
    pout = w2e.shape[1]

    tile_p = max(8, _round_up(int(tile_p), 8))
    if n_packed <= 8:
        tile_p = 8
    else:
        # Cap at ~half the problem: guarantees >= 2 grid steps so the
        # "parallel" axis can be split across v7x's two TensorCores, and
        # avoids over-padding small inputs.
        tile_p = min(tile_p, _round_up(_cdiv(n_packed, 2), 8))
    grid = (_cdiv(n_packed, tile_p),)
    # The ragged last block (n_packed % tile_p != 0, or tile_p > n_packed) is
    # handled by Pallas: out-of-bounds rows of the output block are masked on
    # the HBM store, so values computed from uninitialized tail rows never
    # leak into the result (rows of the MLP are independent).

    flops = 2 * grid[0] * tile_p * (pin * phid + phid * pout)
    bytes_accessed = 4 * (n_packed * (pin + pout)
                          + pin * phid + phid * pout + phid + pout)

    return pl.pallas_call(
        _deepset_mlp_kernel,
        out_shape=jax.ShapeDtypeStruct((n_packed, pout), jnp.float32),
        grid_spec=pl.GridSpec(
            grid=grid,
            in_specs=[
                pl.BlockSpec((tile_p, pin), lambda i: (i, 0)),
                pl.BlockSpec((pin, phid), lambda i: (0, 0)),
                pl.BlockSpec((1, phid), lambda i: (0, 0)),
                pl.BlockSpec((phid, pout), lambda i: (0, 0)),
                pl.BlockSpec((1, pout), lambda i: (0, 0)),
            ],
            out_specs=pl.BlockSpec((tile_p, pout), lambda i: (i, 0)),
        ),
        compiler_params=pltpu.CompilerParams(
            dimension_semantics=("parallel",),
            vmem_limit_bytes=48 * 1024 * 1024,
        ),
        cost_estimate=pl.CostEstimate(
            flops=flops, transcendentals=0, bytes_accessed=bytes_accessed),
    )(xp, w1e, b1e, w2e, b2e)


# ----------------------------------------------------------------------------
# DeepSetEncoder forward (glue reshapes are views; hot path is one pallas_call)
# ----------------------------------------------------------------------------
def deepset_encoder_forward(x, packed_params, *, input_dim, output_dim, pack,
                            tile_p=2048):
    seq_len = x.shape[2]
    x2d = x.reshape((-1, input_dim)).astype(jnp.float32)
    n = x2d.shape[0]

    rem = n % pack
    if rem:
        # Rare path: append < pack zero rows so the lane-dense packing stays a
        # pure row-major view.  Common case (rem == 0) adds no HBM passes.
        x2d = jnp.concatenate(
            [x2d, jnp.zeros((pack - rem, input_dim), jnp.float32)], axis=0)
    n_packed = x2d.shape[0] // pack
    xp = x2d.reshape((n_packed, pack * input_dim))        # free row-major view

    out_packed = _mlp_pallas_packed(
        xp, packed_params["w1e"], packed_params["b1e"],
        packed_params["w2e"], packed_params["b2e"], tile_p=tile_p)

    y2d = out_packed.reshape((n_packed * pack, output_dim))  # free view
    if rem:
        y2d = y2d[:n]                                      # drop padded junk rows
    return y2d.reshape((-1, output_dim, seq_len))           # free view


# ----------------------------------------------------------------------------
# Params / reference
# ----------------------------------------------------------------------------
def init_params(key, input_dim, output_dim, hidden=HIDDEN):
    # Deterministic synthetic init (PyTorch-style uniform(-1/sqrt(fan_in), +)).
    k1, k2, k3, k4 = jax.random.split(key, 4)
    lim1 = 1.0 / jnp.sqrt(input_dim)
    lim2 = 1.0 / jnp.sqrt(hidden)
    # Stored as (in, out) so the kernel computes x @ W  (== x @ W_pt.T).
    w1 = jax.random.uniform(k1, (input_dim, hidden), jnp.float32, -lim1, lim1)
    b1 = jax.random.uniform(k2, (1, hidden), jnp.float32, -lim1, lim1)
    w2 = jax.random.uniform(k3, (hidden, output_dim), jnp.float32, -lim2, lim2)
    b2 = jax.random.uniform(k4, (1, output_dim), jnp.float32, -lim2, lim2)
    return {"w1": w1, "b1": b1, "w2": w2, "b2": b2}


def _reference_forward(x, params, *, input_dim, output_dim):
    seq_len = x.shape[2]
    h = x.reshape((-1, input_dim)).astype(jnp.float32)
    h = jnp.maximum(h @ params["w1"] + params["b1"], 0.0)
    h = jnp.maximum(h @ params["w2"] + params["b2"], 0.0)
    return h.reshape((-1, output_dim, seq_len))


if __name__ == "__main__":
    INPUT_DIM, OUTPUT_DIM = 8, 16

    key = jax.random.PRNGKey(0)
    kx, kp = jax.random.split(key)
    params = init_params(kp, INPUT_DIM, OUTPUT_DIM)

    pack = choose_pack(INPUT_DIM)                 # 16 -> full 128-lane packed rows
    packed = pack_params(params, input_dim=INPUT_DIM, output_dim=OUTPUT_DIM,
                         pack=pack)               # one-time weight expansion
    packed = jax.tree_util.tree_map(jax.block_until_ready, packed)

    fwd = jax.jit(functools.partial(
        deepset_encoder_forward, input_dim=INPUT_DIM, output_dim=OUTPUT_DIM,
        pack=pack, tile_p=2048))

    # (B, C, SEQ) cases: main path / ragged last grid block / N % pack != 0.
    for (B, C, SEQ) in [(2, 8, 8), (8, 9, 16), (3, 8, 8)]:
        x = jax.random.normal(jax.random.fold_in(kx, B * C * SEQ),
                              (B, C, SEQ), dtype=jnp.float32)
        out = jax.block_until_ready(fwd(x, packed))
        ref = _reference_forward(x, params, input_dim=INPUT_DIM,
                                 output_dim=OUTPUT_DIM)
        assert out.shape == ref.shape, (out.shape, ref.shape)
        assert jnp.allclose(out, ref, atol=1e-5, rtol=1e-5), \
            f"mismatch vs reference for shape {(B, C, SEQ)}"

    print("KERNEL_OK")
</pallas_src>

<mosaic_0001>
module attributes {stable_mosaic.version = 11 : i64} {
  func.func @_deepset_mlp_kernel(%arg0: i32, %arg1: memref<8x128xf32, #tpu.memory_space<vmem>>, %arg2: memref<128x384xf32, #tpu.memory_space<vmem>>, %arg3: memref<1x384xf32, #tpu.memory_space<vmem>>, %arg4: memref<384x256xf32, #tpu.memory_space<vmem>>, %arg5: memref<1x256xf32, #tpu.memory_space<vmem>>, %arg6: memref<8x256xf32, #tpu.memory_space<vmem>>) attributes {dimension_semantics = [#tpu.dimension_semantics<parallel>], iteration_bounds = array<i64: 1>, scalar_prefetch = 0 : i64, scratch_operands = 0 : i64, tpu.core_type = #tpu.core_type<tc>, window_params = [{transform_indices = @transform_0, window_bounds = array<i64: 8, 128>}, {pipeline_mode = #tpu.pipeline_mode<synchronous>, transform_indices = @transform_1, window_bounds = array<i64: 128, 384>}, {pipeline_mode = #tpu.pipeline_mode<synchronous>, transform_indices = @transform_2, window_bounds = array<i64: 1, 384>}, {pipeline_mode = #tpu.pipeline_mode<synchronous>, transform_indices = @transform_3, window_bounds = array<i64: 384, 256>}, {pipeline_mode = #tpu.pipeline_mode<synchronous>, transform_indices = @transform_4, window_bounds = array<i64: 1, 256>}, {transform_indices = @transform_5, window_bounds = array<i64: 8, 256>}]} {
    %c0 = arith.constant 0 : index
    %c0_0 = arith.constant 0 : index
    %0 = vector.load %arg1[%c0, %c0_0] : memref<8x128xf32, #tpu.memory_space<vmem>>, vector<8x128xf32>
    %c0_1 = arith.constant 0 : index
    %c0_2 = arith.constant 0 : index
    %1 = vector.load %arg2[%c0_1, %c0_2] : memref<128x384xf32, #tpu.memory_space<vmem>>, vector<128x384xf32>
    %cst = arith.constant dense<0.000000e+00> : vector<8x384xf32>
    %2 = tpu.matmul %0, %1, %cst {dimension_numbers = #tpu.dot_dimension_numbers<[1], [0], [0], [1], [0, 0, 1, 1], [], []>} : vector<8x128xf32>, vector<128x384xf32>, vector<8x384xf32> -> vector<8x384xf32>
    %c0_3 = arith.constant 0 : index
    %c0_4 = arith.constant 0 : index
    %3 = vector.load %arg3[%c0_3, %c0_4] : memref<1x384xf32, #tpu.memory_space<vmem>>, vector<1x384xf32>
    %4 = vector.broadcast %3 : vector<1x384xf32> to vector<8x384xf32>
    %5 = arith.addf %2, %4 : vector<8x384xf32>
    %cst_5 = arith.constant 0.000000e+00 : f32
    %6 = vector.broadcast %cst_5 : f32 to vector<8x384xf32>
    %7 = arith.maximumf %5, %6 : vector<8x384xf32>
    %c0_6 = arith.constant 0 : index
    %c0_7 = arith.constant 0 : index
    %8 = vector.load %arg4[%c0_6, %c0_7] : memref<384x256xf32, #tpu.memory_space<vmem>>, vector<384x256xf32>
    %cst_8 = arith.constant dense<0.000000e+00> : vector<8x256xf32>
    %9 = tpu.matmul %7, %8, %cst_8 {dimension_numbers = #tpu.dot_dimension_numbers<[1], [0], [0], [1], [0, 0, 1, 1], [], []>} : vector<8x384xf32>, vector<384x256xf32>, vector<8x256xf32> -> vector<8x256xf32>
    %c0_9 = arith.constant 0 : index
    %c0_10 = arith.constant 0 : index
    %10 = vector.load %arg5[%c0_9, %c0_10] : memref<1x256xf32, #tpu.memory_space<vmem>>, vector<1x256xf32>
    %11 = vector.broadcast %10 : vector<1x256xf32> to vector<8x256xf32>
    %12 = arith.addf %9, %11 : vector<8x256xf32>
    %cst_11 = arith.constant 0.000000e+00 : f32
    %13 = vector.broadcast %cst_11 : f32 to vector<8x256xf32>
    %14 = arith.maximumf %12, %13 : vector<8x256xf32>
    %c0_12 = arith.constant 0 : index
    %c0_13 = arith.constant 0 : index
    %15 = vector.load %arg6[%c0_12, %c0_13] : memref<8x256xf32, #tpu.memory_space<vmem>>, vector<8x256xf32>
    tpu.vector_store %arg6[%c0_12, %c0_13], %14 {strides = array<i32>} : memref<8x256xf32, #tpu.memory_space<vmem>>, vector<8x256xf32>,
    return
  }
  func.func @transform_0(%arg0: i32) -> (i32, i32) {
    %c0_i32 = arith.constant 0 : i32
    %c0_i32_0 = arith.constant 0 : i32
    return %arg0, %c0_i32 : i32, i32
  }
  func.func @transform_1(%arg0: i32) -> (i32, i32) {
    %c0_i32 = arith.constant 0 : i32
    %c0_i32_0 = arith.constant 0 : i32
    %c0_i32_1 = arith.constant 0 : i32
    return %c0_i32, %c0_i32_0 : i32, i32
  }
  func.func @transform_2(%arg0: i32) -> (i32, i32) {
    %c0_i32 = arith.constant 0 : i32
    %c0_i32_0 = arith.constant 0 : i32
    %c0_i32_1 = arith.constant 0 : i32
    return %c0_i32, %c0_i32_0 : i32, i32
  }
  func.func @transform_3(%arg0: i32) -> (i32, i32) {
    %c0_i32 = arith.constant 0 : i32
    %c0_i32_0 = arith.constant 0 : i32
    %c0_i32_1 = arith.constant 0 : i32
    return %c0_i32, %c0_i32_0 : i32, i32
  }
  func.func @transform_4(%arg0: i32) -> (i32, i32) {
    %c0_i32 = arith.constant 0 : i32
    %c0_i32_0 = arith.constant 0 : i32
    %c0_i32_1 = arith.constant 0 : i32
    return %c0_i32, %c0_i32_0 : i32, i32
  }
  func.func @transform_5(%arg0: i32) -> (i32, i32) {
    %c0_i32 = arith.constant 0 : i32
    %c0_i32_0 = arith.constant 0 : i32
    return %arg0, %c0_i32 : i32, i32
  }
}

</mosaic_0001>

<bundles_post_ra>
// kernel: deepset_encoder_forward.1
= control target key start
LH: loop header
LB: loop body
LE: loop exit
PB: predicated region body
PF: predicated region fallthrough
CT: control target
= control target key end

     0   :  { %10 = vsyncpa [#allocation3], 0  ;;  %s1001_s0 = inlined_call_operand.vmem [shape: f32[1,128], index: 0, kind: input, shape index: {}]   ;;  %s1002_s1 = inlined_call_operand.hbm [shape: f32[128,384], index: 1, kind: input, shape index: {}]   ;;  %s1003_s2 = inlined_call_operand.vmem [shape: f32[1,384], index: 2, kind: input, shape index: {}]   ;;  %s1004_s3 = inlined_call_operand.hbm [shape: f32[384,256], index: 3, kind: input, shape index: {}]   ;;  %s1005_s4 = inlined_call_operand.vmem [shape: f32[1,256], index: 4, kind: input, shape index: {}]   ;;  %s1006_s5 = inlined_call_operand.vmem [shape: f32[1,256], index: 5, kind: output, shape index: {}]  }
   0x1   :  { %11 = vsyncpa [#allocation5], 0  ;;  %s889_s18 = smov [#allocation2]   ;;  %s841_s22 = scalar_lea.hbm %s1002_s1, 6144 }
   0x2   :  { %s19_s19 = sshll.u32 %s889_s18, 4  ;;  %p842_p0 = scmp.ne.s32.totalorder %s1002_s1, %s841_s22  ;;  %s20_s19 = int_to_ptr.vmem [resolvable:$true] %s19_s19 }
   0x3   :  { %p845_p1 = scmp.lt.u32.totalorder %s841_s22, %s1002_s1 }
   0x5   :  { %p847_p2 = pnand %p845_p1, %p842_p0 }
   0x7   :  { %850 = shalt.err (!%p847_p2)
}
   0x8   :  { %s851_s27 = scalar_lea.vmem %s20_s19, 6144  ;;  %p856_p4 = scmp.lt.s32.totalorder %s20_s19, %s20_s19 }
   0x9   :  { %p852_p3 = scmp.ne.s32.totalorder %s20_s19, %s851_s27  ;;  %p857_p5 = scmp.lt.s32.totalorder %s851_s27, %s851_s27 }
   0xb   :  { %p858_p6 = por %p857_p5, %p856_p4 }
   0xd   :  { %p859_p7 = pnand %p858_p6, %p852_p3 }
   0xf   :  { %862 = shalt.err (!%p859_p7)
}
  0x10   :  { %s890_s28 = smov 384   ;;  %s891_s29 = smov 24  }
  0x11   :  { %25 = dma.hbm_to_vmem [thread:$0]  %s1002_s1, 6144, %s20_s19, [#allocation3], %s890_s28, %s890_s28, %s891_s29  }
  0x12   :  { %s892_s7 = smov [#allocation4]   ;;  %s863_s11 = scalar_lea.hbm %s1004_s3, 12288 }
  0x13   :  { %s33_s8 = sshll.u32 %s892_s7, 4  ;;  %p864_p8 = scmp.ne.s32.totalorder %s1004_s3, %s863_s11  ;;  %s34_s8 = int_to_ptr.vmem [resolvable:$true] %s33_s8 }
  0x14   :  { %p867_p9 = scmp.lt.u32.totalorder %s863_s11, %s1004_s3 }
  0x16   :  { %p869_p10 = pnand %p867_p9, %p864_p8 }
  0x18   :  { %872 = shalt.err (!%p869_p10)
}
  0x19   :  { %s873_s16 = scalar_lea.vmem %s34_s8, 12288  ;;  %p878_p12 = scmp.lt.s32.totalorder %s34_s8, %s34_s8 }
  0x1a   :  { %p874_p11 = scmp.ne.s32.totalorder %s34_s8, %s873_s16  ;;  %p879_p13 = scmp.lt.s32.totalorder %s873_s16, %s873_s16 }
  0x1c   :  { %p880_p0 = por %p879_p13, %p878_p12 }
  0x1e   :  { %p881_p1 = pnand %p880_p0, %p874_p11 }
  0x20   :  { %884 = shalt.err (!%p881_p1)
}
  0x21   :  { %s893_s1 = smov 256   ;;  %s894_s17 = smov 16  }
  0x22   :  { %39 = dma.hbm_to_vmem [thread:$0]  %s1004_s3, 12288, %s34_s8, [#allocation5], %s893_s1, %s893_s1, %s894_s17  }
  0x23   :  { %885 = dma.done.wait [#allocation3], 6144  }
  0x24   :  { %886 = vsyncadd [#allocation3], 4294961152 }
  0x25   :  { %887 = dma.done.wait [#allocation5], 12288  }
  0x26   :  { %888 = vsyncadd [#allocation5], 4294955008  ;;  %v895_v0 = vmov 0.0   ;;  %v50_v1 = vld [vmem:[#allocation2 + $0x8] sm:$0xff]  ;;  %v53_v2 = vld [vmem:[#allocation2 + $0x20] sm:$0xff]  ;;  %vm897_vm0 = vmmov 0  }
  0x27   :  { %178 = vmatprep.mubr.f32.mxu1 %v895_v0  ;;  %v49_v3 = vld [vmem:[#allocation2] sm:$0xff]  ;;  %v675_v4 = vpack.c.bf16 %v53_v2, %v50_v1  ;;  %v52_v5 = vld [vmem:[#allocation2 + $0x18] sm:$0xff]  ;;  %v59_v7 = vld [vmem:[#allocation2 + $0x50] sm:$0xff] }
  0x28   :  { %v56_v6 = vld [vmem:[#allocation2 + $0x38] sm:$0xff]  ;;  %v677_v8 = vpack.c.bf16 %v52_v5, %v49_v3  ;;  %v55_v10 = vld [vmem:[#allocation2 + $0x30] sm:$0xff]  ;;  %v58_v11 = vld [vmem:[#allocation2 + $0x48] sm:$0xff] }
  0x29   :  { %v679_v9 = vpack.c.bf16 %v59_v7, %v56_v6  ;;  %v62_v12 = vld [vmem:[#allocation2 + $0x68] sm:$0xff]  ;;  %676 = vmatprep.subr.bf16.mxu1 %v675_v4  ;;  %v65_v13 = vld [vmem:[#allocation2 + $0x80] sm:$0xff]  ;;  %v681_v14 = vpack.c.bf16 %v58_v11, %v55_v10  ;;  %v64_v17 = vld [vmem:[#allocation2 + $0x78] sm:$0xff] }
  0x2a   :  { %678 = vmatpush1.bf16.msra.mxu1 %v677_v8  ;;  %v683_v15 = vpack.c.bf16 %v65_v13, %v62_v12  ;;  %v61_v16 = vld [vmem:[#allocation2 + $0x60] sm:$0xff]  ;;  %v68_v18 = vld [vmem:[#allocation2 + $0x98] sm:$0xff]  ;;  %v71_v19 = vld [vmem:[#allocation2 + $0xb0] sm:$0xff] }
  0x2b   :  { %680 = vmatprep.subr.bf16.mxu1 %v679_v9  ;;  %v685_v20 = vpack.c.bf16 %v64_v17, %v61_v16  ;;  %v687_v21 = vpack.c.bf16 %v71_v19, %v68_v18  ;;  %v67_v22 = vld [vmem:[#allocation2 + $0x90] sm:$0xff]  ;;  %v70_v23 = vld [vmem:[#allocation2 + $0xa8] sm:$0xff]  ;;  %v77_v25 = vld [vmem:[#allocation2 + $0xe0] sm:$0xff] }
  0x2c   :  { %v74_v24 = vld [vmem:[#allocation2 + $0xc8] sm:$0xff]  ;;  %v689_v26 = vpack.c.bf16 %v70_v23, %v67_v22  ;;  %v73_v28 = vld [vmem:[#allocation2 + $0xc0] sm:$0xff]  ;;  %v76_v29 = vld [vmem:[#allocation2 + $0xd8] sm:$0xff] }
  0x2d   :  { %v691_v27 = vpack.c.bf16 %v77_v25, %v74_v24  ;;  %v80_v30 = vld [vmem:[#allocation2 + $0xf8] sm:$0xff]  ;;  %v83_v31 = vld [vmem:[#allocation2 + $0x110] sm:$0xff]  ;;  %v82_v33 = vld [vmem:[#allocation2 + $0x108] sm:$0xff]  ;;  %v693_v34 = vpack.c.bf16 %v76_v29, %v73_v28 }
  0x2e   :  { %682 = vmatpush1.bf16.msra.mxu1 %v681_v14  ;;  %v79_v32 = vld [vmem:[#allocation2 + $0xf0] sm:$0xff]  ;;  %v86_v35 = vld [vmem:[#allocation2 + $0x128] sm:$0xff]  ;;  %v89_v36 = vld [vmem:[#allocation2 + $0x140] sm:$0xff]  ;;  %v695_v39 = vpack.c.bf16 %v83_v31, %v80_v30 }
  0x2f   :  { %684 = vmatprep.subr.bf16.mxu1 %v683_v15  ;;  %v259_v37 = vld [vmem:[#allocation4 + $0x8] sm:$0xff]  ;;  %v261_v38 = vld [vmem:[#allocation4 + $0x18] sm:$0xff]  ;;  %v258_v41 = vld [vmem:[#allocation4] sm:$0xff]  ;;  %v697_v51 = vpack.c.bf16 %v82_v33, %v79_v32  ;;  %v699_v55 = vpack.c.bf16 %v89_v36, %v86_v35 }
  0x30   :  { %v731_v40 = vpack.c.bf16 %v261_v38, %v259_v37  ;;  %v260_v42 = vld [vmem:[#allocation4 + $0x10] sm:$0xff]  ;;  %v263_v43 = vld [vmem:[#allocation4 + $0x28] sm:$0xff]  ;;  %v265_v45 = vld [vmem:[#allocation4 + $0x38] sm:$0xff] }
  0x31   :  { %v733_v44 = vpack.c.bf16 %v260_v42, %v258_v41  ;;  %v262_v46 = vld [vmem:[#allocation4 + $0x20] sm:$0xff]  ;;  %v264_v47 = vld [vmem:[#allocation4 + $0x30] sm:$0xff]  ;;  %v735_v48 = vpack.c.bf16 %v265_v45, %v263_v43  ;;  %v267_v49 = vld [vmem:[#allocation4 + $0x48] sm:$0xff] }
  0x32   :  { %686 = vmatpush1.bf16.msra.mxu1 %v685_v20  ;;  %732 = vmatprep.subr.bf16.mxu0 %v731_v40  ;;  %v269_v50 = vld [vmem:[#allocation4 + $0x58] sm:$0xff]  ;;  %v85_v52 = vld [vmem:[#allocation2 + $0x120] sm:$0xff]  ;;  %v737_v54 = vpack.c.bf16 %v264_v47, %v262_v46  ;;  %v268_v59 = vld [vmem:[#allocation4 + $0x50] sm:$0xff] }
  0x33   :  { %688 = vmatprep.subr.bf16.mxu1 %v687_v21  ;;  %v88_v53 = vld [vmem:[#allocation2 + $0x138] sm:$0xff]  ;;  %734 = vmatpush1.bf16.msra.mxu0 %v733_v44  ;;  %v739_v57 = vpack.c.bf16 %v269_v50, %v267_v49  ;;  %v266_v58 = vld [vmem:[#allocation4 + $0x40] sm:$0xff]  ;;  %v95_v60 = vld [vmem:[#allocation2 + $0x170] sm:$0xff]  ;;  %v896_v21 = vmov 0.0|0.0  }
  0x34   :  { %v92_v56 = vld [vmem:[#allocation2 + $0x158] sm:$0xff]  ;;  %736 = vmatprep.subr.bf16.mxu0 %v735_v48  ;;  %v271_v61 = vld [vmem:[#allocation4 + $0x68] sm:$0xff]  ;;  %v701_v63 = vpack.c.bf16 %v88_v53, %v85_v52  ;;  %v91_v1 = vld [vmem:[#allocation2 + $0x150] sm:$0xff]  ;;  %v741_v2 = vpack.c.bf16 %v268_v59, %v266_v58 }
  0x35   :  { %v273_v62 = vld [vmem:[#allocation4 + $0x78] sm:$0xff]  ;;  %v703_v3 = vpack.c.bf16 %v95_v60, %v92_v56  ;;  %v94_v4 = vld [vmem:[#allocation2 + $0x168] sm:$0xff]  ;;  %v270_v6 = vld [vmem:[#allocation4 + $0x60] sm:$0xff] }
  0x36   :  { %690 = vmatpush1.bf16.msra.mxu1 %v689_v26  ;;  %v743_v5 = vpack.c.bf16 %v273_v62, %v271_v61  ;;  %v272_v7 = vld [vmem:[#allocation4 + $0x70] sm:$0xff]  ;;  %v275_v8 = vld [vmem:[#allocation4 + $0x88] sm:$0xff]  ;;  %v277_v9 = vld [vmem:[#allocation4 + $0x98] sm:$0xff]  ;;  %v705_v10 = vpack.c.bf16 %v94_v4, %v91_v1 }
  0x37   :  { %692 = vmatprep.subr.bf16.mxu1 %v691_v27  ;;  %738 = vmatpush1.bf16.msra.mxu0 %v737_v54  ;;  %v745_v11 = vpack.c.bf16 %v272_v7, %v270_v6  ;;  %v51_v12 = vld [vmem:[#allocation2 + $0x10] sm:$0xff]  ;;  %v54_v13 = vld [vmem:[#allocation2 + $0x28] sm:$0xff]  ;;  %v747_v14 = vpack.c.bf16 %v277_v9, %v275_v8  ;;  %v274_v15 = vld [vmem:[#allocation4 + $0x80] sm:$0xff] }
  0x38   :  { %740 = vmatprep.subr.bf16.mxu0 %v739_v57  ;;  %v276_v16 = vld [vmem:[#allocation4 + $0x90] sm:$0xff]  ;;  %v279_v17 = vld [vmem:[#allocation4 + $0xa8] sm:$0xff]  ;;  %v281_v18 = vld [vmem:[#allocation4 + $0xb8] sm:$0xff]  ;;  %v708_v20 = vpack.c.bf16 %v54_v13, %v51_v12 }
  0x39   :  { %v957_v19 = vld [vmem:[%s1001_s0] sm:$0xff]  ;;  %v60_v23 = vld [vmem:[#allocation2 + $0x58] sm:$0xff]  ;;  %v749_v24 = vpack.c.bf16 %v276_v16, %v274_v15  ;;  %v751_v25 = vpack.c.bf16 %v281_v18, %v279_v17  ;;  %v280_v27 = vld [vmem:[#allocation4 + $0xb0] sm:$0xff] }
  0x3a   :  { %694 = vmatpush1.bf16.msra.mxu1 %v693_v34  ;;  %v57_v22 = vld [vmem:[#allocation2 + $0x40] sm:$0xff]  ;;  %v283_v28 = vld [vmem:[#allocation4 + $0xc8] sm:$0xff]  ;;  %v285_v29 = vld [vmem:[#allocation4 + $0xd8] sm:$0xff] }
  0x3b   :  { %696 = vmatprep.subr.bf16.mxu1 %v695_v39  ;;  %742 = vmatpush1.bf16.msra.mxu0 %v741_v2  ;;  %v278_v26 = vld [vmem:[#allocation4 + $0xa0] sm:$0xff]  ;;  %v711_v30 = vpack.c.bf16 %v60_v23, %v57_v22  ;;  %v63_v31 = vld [vmem:[#allocation2 + $0x70] sm:$0xff]  ;;  %v66_v32 = vld [vmem:[#allocation2 + $0x88] sm:$0xff]  ;;  %v755_v34 = vpack.c.bf16 %v285_v29, %v283_v28 }
  0x3c   :  { %744 = vmatprep.subr.bf16.mxu0 %v743_v5  ;;  %v753_v33 = vpack.c.bf16 %v280_v27, %v278_v26  ;;  %v282_v35 = vld [vmem:[#allocation4 + $0xc0] sm:$0xff]  ;;  %v284_v36 = vld [vmem:[#allocation4 + $0xd0] sm:$0xff]  ;;  %v287_v37 = vld [vmem:[#allocation4 + $0xe8] sm:$0xff]  ;;  %v714_v39 = vpack.c.bf16 %v66_v32, %v63_v31 }
  0x3d   :  { %v289_v38 = vld [vmem:[#allocation4 + $0xf8] sm:$0xff]  ;;  %v69_v40 = vld [vmem:[#allocation2 + $0xa0] sm:$0xff]  ;;  %v757_v42 = vpack.c.bf16 %v284_v36, %v282_v35  ;;  %v288_v45 = vld [vmem:[#allocation4 + $0xf0] sm:$0xff] }
  0x3e   :  { %698 = vmatpush1.bf16.msra.mxu1 %v697_v51  ;;  %v72_v41 = vld [vmem:[#allocation2 + $0xb8] sm:$0xff]  ;;  %v759_v43 = vpack.c.bf16 %v289_v38, %v287_v37  ;;  %v286_v44 = vld [vmem:[#allocation4 + $0xe0] sm:$0xff]  ;;  %v291_v46 = vld [vmem:[#allocation4 + $0x108] sm:$0xff] }
  0x3f   :  { %700 = vmatprep.subr.bf16.mxu1 %v699_v55  ;;  %746 = vmatpush1.bf16.msra.mxu0 %v745_v11  ;;  %v293_v47 = vld [vmem:[#allocation4 + $0x118] sm:$0xff]  ;;  %v717_v48 = vpack.c.bf16 %v72_v41, %v69_v40  ;;  %v75_v49 = vld [vmem:[#allocation2 + $0xd0] sm:$0xff]  ;;  %v78_v50 = vld [vmem:[#allocation2 + $0xe8] sm:$0xff]  ;;  %v761_v51 = vpack.c.bf16 %v288_v45, %v286_v44 }
  0x40   :  { %748 = vmatprep.subr.bf16.mxu0 %v747_v14  ;;  %v763_v52 = vpack.c.bf16 %v293_v47, %v291_v46  ;;  %v290_v53 = vld [vmem:[#allocation4 + $0x100] sm:$0xff]  ;;  %v292_v54 = vld [vmem:[#allocation4 + $0x110] sm:$0xff]  ;;  %v295_v55 = vld [vmem:[#allocation4 + $0x128] sm:$0xff]  ;;  %v720_v57 = vpack.c.bf16 %v78_v50, %v75_v49 }
  0x41   :  { %v297_v56 = vld [vmem:[#allocation4 + $0x138] sm:$0xff]  ;;  %v81_v58 = vld [vmem:[#allocation2 + $0x100] sm:$0xff]  ;;  %v765_v60 = vpack.c.bf16 %v292_v54, %v290_v53  ;;  %v299_v1 = vld [vmem:[#allocation4 + $0x148] sm:$0xff] }
  0x42   :  { %702 = vmatpush1.bf16.msra.mxu1 %v701_v63  ;;  %v84_v59 = vld [vmem:[#allocation2 + $0x118] sm:$0xff]  ;;  %v767_v61 = vpack.c.bf16 %v297_v56, %v295_v55  ;;  %v294_v62 = vld [vmem:[#allocation4 + $0x120] sm:$0xff]  ;;  %v296_v63 = vld [vmem:[#allocation4 + $0x130] sm:$0xff] }
  0x43   :  { %704 = vmatprep.subr.bf16.mxu1 %v703_v3  ;;  %750 = vmatpush1.bf16.msra.mxu0 %v749_v24  ;;  %v301_v2 = vld [vmem:[#allocation4 + $0x158] sm:$0xff]  ;;  %v723_v3 = vpack.c.bf16 %v84_v59, %v81_v58  ;;  %v87_v4 = vld [vmem:[#allocation2 + $0x130] sm:$0xff]  ;;  %v90_v5 = vld [vmem:[#allocation2 + $0x148] sm:$0xff]  ;;  %v769_v6 = vpack.c.bf16 %v296_v63, %v294_v62 }
  0x44   :  { %752 = vmatprep.subr.bf16.mxu0 %v751_v25  ;;  %v771_v7 = vpack.c.bf16 %v301_v2, %v299_v1  ;;  %v298_v8 = vld [vmem:[#allocation4 + $0x140] sm:$0xff]  ;;  %v300_v9 = vld [vmem:[#allocation4 + $0x150] sm:$0xff]  ;;  %v305_v11 = vld [vmem:[#allocation4 + $0x178] sm:$0xff]  ;;  %v726_v12 = vpack.c.bf16 %v90_v5, %v87_v4 }
  0x45   :  { %v93_v13 = vld [vmem:[#allocation2 + $0x160] sm:$0xff]  ;;  %v96_v14 = vld [vmem:[#allocation2 + $0x178] sm:$0xff]  ;;  %v773_v15 = vpack.c.bf16 %v300_v9, %v298_v8  ;;  %v304_v18 = vld [vmem:[#allocation4 + $0x170] sm:$0xff] }
  0x46   :  { %706 = vmatpush1.bf16.msra.mxu1 %v705_v10  ;;  %v303_v10 = vld [vmem:[#allocation4 + $0x168] sm:$0xff]  ;;  %v302_v17 = vld [vmem:[#allocation4 + $0x160] sm:$0xff]  ;;  %v309_v22 = vld [vmem:[#allocation4 + $0x198] sm:$0xff]  ;;  %v729_v23 = vpack.c.bf16 %v96_v14, %v93_v13 }
  0x47   :  { %707 = vmatprep.subr.bf16.mxu1 %v896_v21  ;;  %754 = vmatpush1.bf16.msra.mxu0 %v753_v33  ;;  %v775_v16 = vpack.c.bf16 %v305_v11, %v303_v10  ;;  %v777_v24 = vpack.c.bf16 %v304_v18, %v302_v17  ;;  %v306_v26 = vld [vmem:[#allocation4 + $0x180] sm:$0xff]  ;;  %v308_v27 = vld [vmem:[#allocation4 + $0x190] sm:$0xff]  ;;  %v311_v28 = vld [vmem:[#allocation4 + $0x1a8] sm:$0xff] }
  0x48   :  { %756 = vmatprep.subr.bf16.mxu0 %v755_v34  ;;  %v313_v29 = vld [vmem:[#allocation4 + $0x1b8] sm:$0xff]  ;;  %v310_v32 = vld [vmem:[#allocation4 + $0x1a0] sm:$0xff]  ;;  %v312_v33 = vld [vmem:[#allocation4 + $0x1b0] sm:$0xff] }
  0x49   :  { %179 = vmatmul.mubr.f32.vlgmr.msra.gmra.mrb[0].mxu1 %v957_v19  ;;  %v783_v31 = vpack.c.bf16 %v313_v29, %v311_v28  ;;  %v315_v34 = vld [vmem:[#allocation4 + $0x1c8] sm:$0xff]  ;;  %v317_v35 = vld [vmem:[#allocation4 + $0x1d8] sm:$0xff]  ;;  %v314_v37 = vld [vmem:[#allocation4 + $0x1c0] sm:$0xff] }
  0x4a   :  { %709 = vmatpush3.bf16.msra.mxu1 %v708_v20  ;;  %672 = vmatprep.mubr.msk.f32.mxu1 %vm897_vm0, %v895_v0  ;;  %v307_v20 = vld [vmem:[#allocation4 + $0x188] sm:$0xff]  ;;  %v787_v36 = vpack.c.bf16 %v317_v35, %v315_v34  ;;  %v316_v38 = vld [vmem:[#allocation4 + $0x1d0] sm:$0xff]  ;;  %v321_v41 = vld [vmem:[#allocation4 + $0x1f8] sm:$0xff] }
  0x4b   :  { %710 = vmatprep.subr.bf16.mxu1 %v896_v21  ;;  %758 = vmatpush1.bf16.msra.mxu0 %v757_v42  ;;  %v779_v25 = vpack.c.bf16 %v309_v22, %v307_v20  ;;  %v319_v40 = vld [vmem:[#allocation4 + $0x1e8] sm:$0xff]  ;;  %v320_v44 = vld [vmem:[#allocation4 + $0x1f0] sm:$0xff]  ;;  %v325_v46 = vld [vmem:[#allocation4 + $0x218] sm:$0xff] }
  0x4c   :  { %760 = vmatprep.subr.bf16.mxu0 %v759_v43  ;;  %v791_v42 = vpack.c.bf16 %v321_v41, %v319_v40  ;;  %v318_v43 = vld [vmem:[#allocation4 + $0x1e0] sm:$0xff]  ;;  %v324_v59 = vld [vmem:[#allocation4 + $0x210] sm:$0xff]  ;;  %v329_v62 = vld [vmem:[#allocation4 + $0x238] sm:$0xff] }
  0x4d   :  { %v793_v45 = vpack.c.bf16 %v320_v44, %v318_v43  ;;  %v322_v58 = vld [vmem:[#allocation4 + $0x200] sm:$0xff]  ;;  %v328_v5 = vld [vmem:[#allocation4 + $0x230] sm:$0xff]  ;;  %v337_v13 = vld [vmem:[#allocation4 + $0x278] sm:$0xff] }
  0x4e   :  { %712 = vmatpush3.bf16.msra.mxu1 %v711_v30  ;;  %v781_v30 = vpack.c.bf16 %v308_v27, %v306_v26  ;;  %v797_v1 = vpack.c.bf16 %v324_v59, %v322_v58  ;;  %v326_v4 = vld [vmem:[#allocation4 + $0x220] sm:$0xff]  ;;  %v332_v11 = vld [vmem:[#allocation4 + $0x250] sm:$0xff]  ;;  %v339_v18 = vld [vmem:[#allocation4 + $0x288] sm:$0xff] }
  0x4f   :  { %713 = vmatprep.subr.bf16.mxu1 %v896_v21  ;;  %762 = vmatpush1.bf16.msra.mxu0 %v761_v51  ;;  %v977_v51 = vld [vmem:[%s1003_s2] sm:$0x7]  ;;  %v801_v8 = vpack.c.bf16 %v328_v5, %v326_v4  ;;  %v336_v17 = vld [vmem:[#allocation4 + $0x270] sm:$0xff]  ;;  %v341_v20 = vld [vmem:[#allocation4 + $0x298] sm:$0xff] }
  0x50   :  { %764 = vmatprep.subr.bf16.mxu0 %v763_v52  ;;  %v330_v10 = vld [vmem:[#allocation4 + $0x240] sm:$0xff]  ;;  %v345_v26 = vld [vmem:[#allocation4 + $0x2b8] sm:$0xff]  ;;  %v352_v43 = vld [vmem:[#allocation4 + $0x2f0] sm:$0xff] }
  0x51   :  { %v805_v14 = vpack.c.bf16 %v332_v11, %v330_v10  ;;  %v342_v29 = vld [vmem:[#allocation4 + $0x2a0] sm:$0xff] }
  0x52   :  { %715 = vmatpush3.bf16.msra.mxu1 %v714_v39  ;;  %v789_v39 = vpack.c.bf16 %v316_v38, %v314_v37  ;;  %v346_v35 = vld [vmem:[#allocation4 + $0x2c0] sm:$0xff]  ;;  %v351_v37 = vld [vmem:[#allocation4 + $0x2e8] sm:$0xff]  ;;  %v353_v38 = vld [vmem:[#allocation4 + $0x2f8] sm:$0xff] }
  0x53   :  { %716 = vmatprep.subr.bf16.mxu1 %v896_v21  ;;  %766 = vmatpush1.bf16.msra.mxu0 %v765_v60  ;;  %v823_v41 = vpack.c.bf16 %v353_v38, %v351_v37 }
  0x54   :  { %768 = vmatprep.subr.bf16.mxu0 %v767_v61  ;;  %v327_v61 = vld [vmem:[#allocation4 + $0x228] sm:$0xff] }
  0x56   :  { %718 = vmatpush3.bf16.msra.mxu1 %v717_v48  ;;  %v99_v48 = vlaneseq }
  0x57   :  { %719 = vmatprep.subr.bf16.mxu1 %v896_v21  ;;  %770 = vmatpush1.bf16.msra.mxu0 %v769_v6  ;;  %v331_v6 = vld [vmem:[#allocation4 + $0x248] sm:$0xff] }
  0x58   :  { %772 = vmatprep.subr.bf16.mxu0 %v771_v7  ;;  %v971_v49 = vshrl.u32 %v99_v48, 7  ;;  %v333_v7 = vld [vmem:[#allocation4 + $0x258] sm:$0xff]  ;;  %vm572_vm1 = vcmp.lt.s32.totalorder %v99_v48, 256 }
  0x59   :  { %v803_v9 = vpack.c.bf16 %v333_v7, %v331_v6 }
  0x5a   :  { %721 = vmatpush3.bf16.msra.mxu1 %v720_v57  ;;  %v101_v50 = vsub.s32 0, %v971_v49  ;;  %v105_v52 = vsub.s32 1, %v971_v49 }
  0x5b   :  { %722 = vmatprep.subr.bf16.mxu1 %v896_v21  ;;  %774 = vmatpush1.bf16.msra.mxu0 %v773_v15 }
  0x5c   :  { %776 = vmatprep.subr.bf16.mxu0 %v775_v16  ;;  %v102_v53 = vrot.slane %v977_v51, %v101_v50  ;;  %v106_v54 = vrot.slane %v977_v51, %v105_v52  ;;  %v334_v16 = vld [vmem:[#allocation4 + $0x260] sm:$0xff] }
  0x5d   :  { %v809_v22 = vpack.c.bf16 %v336_v17, %v334_v16 }
  0x5e   :  { %724 = vmatpush3.bf16.msra.mxu1 %v723_v3  ;;  %v799_v3 = vpack.c.bf16 %v329_v62, %v327_v61 }
  0x5f   :  { %725 = vmatprep.subr.bf16.mxu1 %v896_v21  ;;  %778 = vmatpush1.bf16.msra.mxu0 %v777_v24  ;;  %v338_v24 = vld [vmem:[#allocation4 + $0x280] sm:$0xff] }
  0x60   :  { %780 = vmatprep.subr.bf16.mxu0 %v779_v25  ;;  %v343_v25 = vld [vmem:[#allocation4 + $0x2a8] sm:$0xff] }
  0x61   :  { %v815_v28 = vpack.c.bf16 %v345_v26, %v343_v25 }
  0x62   :  { %727 = vmatpush3.bf16.msra.mxu1 %v726_v12  ;;  %v335_v12 = vld [vmem:[#allocation4 + $0x268] sm:$0xff] }
  0x63   :  { %728 = vmatprep.subr.bf16.mxu1 %v896_v21  ;;  %782 = vmatpush1.bf16.msra.mxu0 %v781_v30  ;;  %v785_v21 = vpack.c.bf16 %v312_v33, %v310_v32  ;;  %v807_v15 = vpack.c.bf16 %v337_v13, %v335_v12  ;;  %v344_v30 = vld [vmem:[#allocation4 + $0x2b0] sm:$0xff]  ;;  %v349_v32 = vld [vmem:[#allocation4 + $0x2d8] sm:$0xff] }
  0x64   :  { %784 = vmatprep.subr.bf16.mxu0 %v783_v31  ;;  %v347_v31 = vld [vmem:[#allocation4 + $0x2c8] sm:$0xff]  ;;  %v817_v33 = vpack.c.bf16 %v344_v30, %v342_v29 }
  0x65   :  { %v819_v34 = vpack.c.bf16 %v349_v32, %v347_v31 }
  0x66   :  { %730 = vmatpush3.bf16.msra.mxu1 %v729_v23  ;;  %v811_v23 = vpack.c.bf16 %v341_v20, %v339_v18 }
  0x67   :  { %786 = vmatpush1.bf16.msra.mxu0 %v785_v21  ;;  %v348_v21 = vld [vmem:[#allocation4 + $0x2d0] sm:$0xff] }
  0x68   :  { %788 = vmatprep.subr.bf16.mxu0 %v787_v36  ;;  %v109_v36 = vsub.s32 2, %v971_v49 }
  0x69   :  { %673 = vmatmul.mubr.f32.vlgmr.msra.gmra.mrb[2].mxu1 %v957_v19  ;;  %v323_v19 = vld [vmem:[#allocation4 + $0x208] sm:$0xff] }
  0x6a   :  { %v795_v47 = vpack.c.bf16 %v325_v46, %v323_v19  ;;  %v110_v40 = vrot.slane %v977_v51, %v109_v36 }
  0x6b   :  { %790 = vmatpush1.bf16.msra.mxu0 %v789_v39  ;;  %v821_v39 = vpack.c.bf16 %v348_v21, %v346_v35 }
  0x6c   :  { %792 = vmatprep.subr.bf16.mxu0 %v791_v42  ;;  %v350_v42 = vld [vmem:[#allocation4 + $0x2e0] sm:$0xff] }
  0x6f   :  { %794 = vmatpush1.bf16.msra.mxu0 %v793_v45  ;;  %v825_v45 = vpack.c.bf16 %v352_v43, %v350_v42 }
  0x70   :  { %796 = vmatprep.subr.bf16.mxu0 %v795_v47 }
 0x11c   :  { %v180_v55 = vpop.f32.mrb[0].mxu1 }
 0x11d   :  { %v181_v56 = vadd.f32 %v180_v55, %v102_v53  ;;  %v182_v57 = vpop.f32.mrb[1].mxu1  ;;  %v354_v53 = vld [vmem:[%s1005_s4] sm:$0x3] }
 0x11e   :  { %v183_v60 = vadd.f32 %v182_v57, %v106_v54  ;;  %v898_v54 = vmov 1966171168   ;;  %v359_v51 = vrot.slane %v354_v53, %v101_v50 }
 0x11f   :  { %v255_v2 = vmax.f32 %v181_v56, 0.0  ;;  %v515_v55 = vunpack.c.l.s4 %v898_v54  ;;  %v363_v56 = vrot.slane %v354_v53, %v105_v52 }
 0x120   :  { %v256_v63 = vmax.f32 %v183_v60, 0.0 }
 0x121   :  { %v516_v57 = vunpack.c.0.s8 %v515_v55 }
 0x122   :  { %430 = vmatprep.mubr.f32.mxu0 %v256_v63 }
 0x123   :  { %431 = vmatmul.mubr.f32.vlgmr.msra.gmra.mrb[0].mxu0 %v255_v2  ;;  %v519_v63 = vsub.s32 %v516_v57, %v971_v49 }
 0x124   :  { %798 = vmatpush1.bf16.msra.mxu0 %v797_v1  ;;  %501 = vmatprep.mubr.f32.mxu0 %v895_v0  ;;  %v340_v0 = vld [vmem:[#allocation4 + $0x290] sm:$0xff] }
 0x125   :  { %800 = vmatprep.subr.bf16.mxu0 %v799_v3  ;;  %v813_v27 = vpack.c.bf16 %v340_v0, %v338_v24 }
 0x128   :  { %802 = vmatpush1.bf16.msra.mxu0 %v801_v8 }
 0x129   :  { %804 = vmatprep.subr.bf16.mxu0 %v803_v9 }
 0x12c   :  { %806 = vmatpush1.bf16.msra.mxu0 %v805_v14 }
 0x12d   :  { %808 = vmatprep.subr.bf16.mxu0 %v807_v15 }
 0x130   :  { %810 = vmatpush1.bf16.msra.mxu0 %v809_v22 }
 0x131   :  { %812 = vmatprep.subr.bf16.mxu0 %v811_v23 }
 0x134   :  { %814 = vmatpush1.bf16.msra.mxu0 %v813_v27 }
 0x135   :  { %816 = vmatprep.subr.bf16.mxu0 %v815_v28 }
 0x138   :  { %818 = vmatpush1.bf16.msra.mxu0 %v817_v33 }
 0x139   :  { %820 = vmatprep.subr.bf16.mxu0 %v819_v34 }
 0x13c   :  { %822 = vmatpush1.bf16.msra.mxu0 %v821_v39  ;;  %v251_v44 = vpop.f32.mrb[2].mxu1 }
 0x13d   :  { %v252_v19 = vadd.f32 %v251_v44, %v110_v40  ;;  %v674_v46 = vpop.f32.mrb[3].mxu1  ;;  %824 = vmatprep.subr.bf16.mxu0 %v823_v41 }
 0x13f   :  { %v257_v47 = vmax.f32 %v252_v19, 0.0 }
 0x140   :  { %826 = vmatpush1.bf16.msra.mxu0 %v825_v45 }
 0x143   :  { %502 = vmatmul.mubr.f32.vlgmr.msra.gmra.mrb[0].mxu0 %v257_v47 }
 0x216   :  { %v503_v58 = vpop.f32.mrb[0].mxu0 }
 0x217   :  { %v827_v59 = vadd.f32 %v503_v58, %v359_v51  ;;  %v505_v60 = vpop.f32.mrb[1].mxu0 }
 0x218   :  { %v828_v61 = vadd.f32 %v505_v60, %v363_v56 }
 0x219   :  { %v508_v62 = vmax.f32 %v827_v59, 0.0 }
 0x21a   :  { %v509_v1 = vmax.f32 %v828_v61, 0.0 }
 0x21c   :  { %v512_v2 = vcombine.low %v508_v62, %v509_v1 }
 0x21e   :  { %v520_v3 = vrot.slane %v512_v2, %v519_v63 }
 0x220   :  { %v536_v4 = vrot.slane %v520_v3, %v519_v63 }
 0x222   :  { %574 = vst.msk [vmem:[#allocation6] sm:$0x3] %vm572_vm1, %v536_v4 }
 0x229   :  { %v599_v5 = vld [vmem:[#allocation6] sm:$0x3] }
 0x22a   :  { %600 = vst [vmem:[%s1006_s5] sm:$0x3] %v599_v5 }
 0x22b   :  { %617 = vsyncpa [#allocation3], 1 }
 0x22c   :  { %618 = vsyncpa [#allocation5], 1 }

</bundles_post_ra>
